<compile_context>
chip_gen: v5e
topology: v5e:2x2
jax: 0.10.0
libtpu: 0.0.40
codegen_flags: <defaults>
</compile_context>

<pallas_src>
import jax
import jax.numpy as jnp
from jax.experimental import pallas as pl
from jax.experimental.pallas import tpu as pltpu

LANES = 128  # MXU / vreg lane width; all hidden dims padded to this.


def net_kernel(x_ref, w1_ref, w2_ref, w3_ref, w4_ref, b_ref, o_ref):
    # fc1 (+ folded BN1) -> ReLU.  Dropout = identity in eval mode.
    h = jnp.dot(x_ref[...], w1_ref[...], preferred_element_type=jnp.float32)
    h = jnp.maximum(h + b_ref[0:1, :], 0.0)
    # fc2 (+ folded BN2) -> ReLU
    h = jnp.dot(h.astype(jnp.bfloat16), w2_ref[...],
                preferred_element_type=jnp.float32)
    h = jnp.maximum(h + b_ref[1:2, :], 0.0)
    # fc3 (+ folded BN3) -> ReLU
    h = jnp.dot(h.astype(jnp.bfloat16), w3_ref[...],
                preferred_element_type=jnp.float32)
    h = jnp.maximum(h + b_ref[2:3, :], 0.0)
    # fc4: lane-padded to 128 output columns (only column 0 is meaningful),
    # keeping the output store lane-dense.
    o = jnp.dot(h.astype(jnp.bfloat16), w4_ref[...],
                preferred_element_type=jnp.float32)
    o_ref[...] = (o + b_ref[3:4, :]).astype(o_ref.dtype)


def _round_up(n, m):
    return ((n + m - 1) // m) * m


def net_forward(x, kparams, tb=512):
    """x: (B, n_features) float.  kparams: output of fold_and_pad_params."""
    B, F = x.shape
    TB = min(tb, _round_up(B, 8))          # batch tile, multiple of 8 sublanes
    Bp = _round_up(B, TB)                  # padded batch
    if Bp != B:
        x = jnp.pad(x, ((0, Bp - B), (0, 0)))
    x = x.astype(jnp.bfloat16)

    w1, w2, w3, w4 = kparams["w1"], kparams["w2"], kparams["w3"], kparams["w4"]
    biases = kparams["b"]
    P = LANES
    grid = (Bp // TB,)

    flops = 2 * Bp * (F * P + 3 * P * P)
    bytes_accessed = (
        x.size * x.dtype.itemsize
        + sum(w.size * w.dtype.itemsize for w in (w1, w2, w3, w4))
        + biases.size * biases.dtype.itemsize
        + Bp * P * 4)

    out = pl.pallas_call(
        net_kernel,
        out_shape=jax.ShapeDtypeStruct((Bp, P), jnp.float32),
        grid=grid,
        in_specs=[
            pl.BlockSpec((TB, F), lambda i: (i, 0)),   # x: batch-tiled
            pl.BlockSpec((F, P), lambda i: (0, 0)),    # w1 (resident)
            pl.BlockSpec((P, P), lambda i: (0, 0)),    # w2 (resident)
            pl.BlockSpec((P, P), lambda i: (0, 0)),    # w3 (resident)
            pl.BlockSpec((P, P), lambda i: (0, 0)),    # w4 (resident)
            pl.BlockSpec((4, P), lambda i: (0, 0)),    # packed biases
        ],
        out_specs=pl.BlockSpec((TB, P), lambda i: (i, 0)),
        compiler_params=pltpu.CompilerParams(
            dimension_semantics=("parallel",)),
        cost_estimate=pl.CostEstimate(
            flops=flops, transcendentals=0, bytes_accessed=bytes_accessed),
    )(x, w1, w2, w3, w4, biases)

    # Real result lives in lane 0; drop batch padding too.
    return out[:B, :1]


def init_params(key, n_features, l1, l2, l3, eps=1e-5):
    """Raw PyTorch-style parameters for Net(n_features, l1, l2, l3)."""
    ks = jax.random.split(key, 20)

    def linear(kw, kb, fan_in, fan_out):
        bound = 1.0 / jnp.sqrt(fan_in)
        # stored as (in, out): pre-transposed PyTorch weight
        w = jax.random.uniform(kw, (fan_in, fan_out), jnp.float32, -bound, bound)
        b = jax.random.uniform(kb, (1, fan_out), jnp.float32, -bound, bound)
        return w, b

    def bn(kg, kb2, km, kv, dim):
        # Non-trivial BN params so the folding path is actually exercised.
        return dict(
            gamma=jax.random.uniform(kg, (1, dim), jnp.float32, 0.5, 1.5),
            beta=jax.random.uniform(kb2, (1, dim), jnp.float32, -0.5, 0.5),
            mean=jax.random.uniform(km, (1, dim), jnp.float32, -0.5, 0.5),
            var=jax.random.uniform(kv, (1, dim), jnp.float32, 0.5, 1.5),
            eps=eps)

    w1, b1 = linear(ks[0], ks[1], n_features, l1)
    w2, b2 = linear(ks[2], ks[3], l1, l2)
    w3, b3 = linear(ks[4], ks[5], l2, l3)
    w4, b4 = linear(ks[6], ks[7], l3, 1)
    return dict(w1=w1, b1=b1, w2=w2, b2=b2, w3=w3, b3=b3, w4=w4, b4=b4,
                bn1=bn(ks[8], ks[9], ks[10], ks[11], l1),
                bn2=bn(ks[12], ks[13], ks[14], ks[15], l2),
                bn3=bn(ks[16], ks[17], ks[18], ks[19], l3))


def fold_and_pad_params(raw):
    """Fold BN into the Linears, zero-pad to 128 lanes, pack biases, cast bf16."""
    P = LANES

    def fold(w, b, bnp):
        scale = bnp["gamma"] / jnp.sqrt(bnp["var"] + bnp["eps"])   # (1, out)
        shift = bnp["beta"] - bnp["mean"] * scale
        return w * scale, b * scale + shift

    w1, b1 = fold(raw["w1"], raw["b1"], raw["bn1"])
    w2, b2 = fold(raw["w2"], raw["b2"], raw["bn2"])
    w3, b3 = fold(raw["w3"], raw["b3"], raw["bn3"])
    w4, b4 = raw["w4"], raw["b4"]

    def pad_w(w, rows, cols):
        out = jnp.zeros((rows, cols), jnp.float32)
        return out.at[:w.shape[0], :w.shape[1]].set(w)

    F = raw["w1"].shape[0]
    w1p = pad_w(w1, F, P)
    w2p = pad_w(w2, P, P)
    w3p = pad_w(w3, P, P)
    w4p = pad_w(w4, P, P)

    biases = jnp.zeros((4, P), jnp.float32)
    biases = biases.at[0, :b1.shape[1]].set(b1[0])
    biases = biases.at[1, :b2.shape[1]].set(b2[0])
    biases = biases.at[2, :b3.shape[1]].set(b3[0])
    biases = biases.at[3, :b4.shape[1]].set(b4[0])

    return dict(w1=w1p.astype(jnp.bfloat16), w2=w2p.astype(jnp.bfloat16),
                w3=w3p.astype(jnp.bfloat16), w4=w4p.astype(jnp.bfloat16),
                b=biases)


def net_reference(x, raw):
    """Pure-JAX f32 reference matching the PyTorch eval-mode forward."""
    def bn(h, p):
        return (h - p["mean"]) / jnp.sqrt(p["var"] + p["eps"]) * p["gamma"] + p["beta"]
    h = jnp.maximum(bn(x @ raw["w1"] + raw["b1"], raw["bn1"]), 0.0)
    h = jnp.maximum(bn(h @ raw["w2"] + raw["b2"], raw["bn2"]), 0.0)
    h = jnp.maximum(bn(h @ raw["w3"] + raw["b3"], raw["bn3"]), 0.0)
    return h @ raw["w4"] + raw["b4"]


if __name__ == "__main__":
    key = jax.random.PRNGKey(0)
    k_x, k_p, k_x2 = jax.random.split(key, 3)

    n_features, l1, l2, l3 = 32, 64, 32, 16
    raw = init_params(k_p, n_features, l1, l2, l3)
    kparams = fold_and_pad_params(raw)

    # Small batch (single grid step).
    B = 8
    x = jax.random.normal(k_x, (B, n_features), jnp.float32)
    out = jax.block_until_ready(net_forward(x, kparams))
    ref = net_reference(x, raw)
    assert out.shape == (B, 1)
    assert jnp.allclose(out, ref, atol=5e-2, rtol=5e-2), \
        float(jnp.max(jnp.abs(out - ref)))

    # Larger batch exercising the batch grid (2 tiles of 512 rows).
    B2 = 1024
    x2 = jax.random.normal(k_x2, (B2, n_features), jnp.float32)
    out2 = jax.block_until_ready(net_forward(x2, kparams))
    ref2 = net_reference(x2, raw)
    assert out2.shape == (B2, 1)
    assert jnp.allclose(out2, ref2, atol=5e-2, rtol=5e-2), \
        float(jnp.max(jnp.abs(out2 - ref2)))

    print("KERNEL_OK")
</pallas_src>

<mosaic_0001>
module attributes {stable_mosaic.version = 11 : i64} {
  func.func @net_kernel(%arg0: i32, %arg1: memref<8x32xbf16, #tpu.memory_space<vmem>>, %arg2: memref<32x128xbf16, #tpu.memory_space<vmem>>, %arg3: memref<128x128xbf16, #tpu.memory_space<vmem>>, %arg4: memref<128x128xbf16, #tpu.memory_space<vmem>>, %arg5: memref<128x128xbf16, #tpu.memory_space<vmem>>, %arg6: memref<4x128xf32, #tpu.memory_space<vmem>>, %arg7: memref<8x128xf32, #tpu.memory_space<vmem>>) attributes {dimension_semantics = [#tpu.dimension_semantics<parallel>], iteration_bounds = array<i64: 1>, scalar_prefetch = 0 : i64, scratch_operands = 0 : i64, tpu.core_type = #tpu.core_type<tc>, window_params = [{transform_indices = @transform_0, window_bounds = array<i64: 8, 32>}, {pipeline_mode = #tpu.pipeline_mode<synchronous>, transform_indices = @transform_1, window_bounds = array<i64: 32, 128>}, {pipeline_mode = #tpu.pipeline_mode<synchronous>, transform_indices = @transform_2, window_bounds = array<i64: 128, 128>}, {pipeline_mode = #tpu.pipeline_mode<synchronous>, transform_indices = @transform_3, window_bounds = array<i64: 128, 128>}, {pipeline_mode = #tpu.pipeline_mode<synchronous>, transform_indices = @transform_4, window_bounds = array<i64: 128, 128>}, {pipeline_mode = #tpu.pipeline_mode<synchronous>, transform_indices = @transform_5, window_bounds = array<i64: 4, 128>}, {transform_indices = @transform_6, window_bounds = array<i64: 8, 128>}]} {
    %c0 = arith.constant 0 : index
    %c0_0 = arith.constant 0 : index
    %0 = vector.load %arg1[%c0, %c0_0] : memref<8x32xbf16, #tpu.memory_space<vmem>>, vector<8x32xbf16>
    %c0_1 = arith.constant 0 : index
    %c0_2 = arith.constant 0 : index
    %1 = vector.load %arg2[%c0_1, %c0_2] : memref<32x128xbf16, #tpu.memory_space<vmem>>, vector<32x128xbf16>
    %cst = arith.constant dense<0.000000e+00> : vector<8x128xf32>
    %2 = tpu.matmul %0, %1, %cst {dimension_numbers = #tpu.dot_dimension_numbers<[1], [0], [0], [1], [0, 0, 1, 1], [], []>} : vector<8x32xbf16>, vector<32x128xbf16>, vector<8x128xf32> -> vector<8x128xf32>
    %c0_3 = arith.constant 0 : index
    %c0_4 = arith.constant 0 : index
    %3 = vector.load %arg6[%c0_3, %c0_4] : memref<4x128xf32, #tpu.memory_space<vmem>>, vector<1x128xf32>
    %4 = vector.broadcast %3 : vector<1x128xf32> to vector<8x128xf32>
    %5 = arith.addf %2, %4 : vector<8x128xf32>
    %cst_5 = arith.constant 0.000000e+00 : f32
    %6 = vector.broadcast %cst_5 : f32 to vector<8x128xf32>
    %7 = arith.maximumf %5, %6 : vector<8x128xf32>
    %8 = arith.truncf %7 : vector<8x128xf32> to vector<8x128xbf16>
    %c0_6 = arith.constant 0 : index
    %c0_7 = arith.constant 0 : index
    %9 = vector.load %arg3[%c0_6, %c0_7] : memref<128x128xbf16, #tpu.memory_space<vmem>>, vector<128x128xbf16>
    %cst_8 = arith.constant dense<0.000000e+00> : vector<8x128xf32>
    %10 = tpu.matmul %8, %9, %cst_8 {dimension_numbers = #tpu.dot_dimension_numbers<[1], [0], [0], [1], [0, 0, 1, 1], [], []>} : vector<8x128xbf16>, vector<128x128xbf16>, vector<8x128xf32> -> vector<8x128xf32>
    %c1 = arith.constant 1 : index
    %c0_9 = arith.constant 0 : index
    %11 = vector.load %arg6[%c1, %c0_9] : memref<4x128xf32, #tpu.memory_space<vmem>>, vector<1x128xf32>
    %12 = vector.broadcast %11 : vector<1x128xf32> to vector<8x128xf32>
    %13 = arith.addf %10, %12 : vector<8x128xf32>
    %cst_10 = arith.constant 0.000000e+00 : f32
    %14 = vector.broadcast %cst_10 : f32 to vector<8x128xf32>
    %15 = arith.maximumf %13, %14 : vector<8x128xf32>
    %16 = arith.truncf %15 : vector<8x128xf32> to vector<8x128xbf16>
    %c0_11 = arith.constant 0 : index
    %c0_12 = arith.constant 0 : index
    %17 = vector.load %arg4[%c0_11, %c0_12] : memref<128x128xbf16, #tpu.memory_space<vmem>>, vector<128x128xbf16>
    %cst_13 = arith.constant dense<0.000000e+00> : vector<8x128xf32>
    %18 = tpu.matmul %16, %17, %cst_13 {dimension_numbers = #tpu.dot_dimension_numbers<[1], [0], [0], [1], [0, 0, 1, 1], [], []>} : vector<8x128xbf16>, vector<128x128xbf16>, vector<8x128xf32> -> vector<8x128xf32>
    %c2 = arith.constant 2 : index
    %c0_14 = arith.constant 0 : index
    %19 = vector.load %arg6[%c2, %c0_14] : memref<4x128xf32, #tpu.memory_space<vmem>>, vector<1x128xf32>
    %20 = vector.broadcast %19 : vector<1x128xf32> to vector<8x128xf32>
    %21 = arith.addf %18, %20 : vector<8x128xf32>
    %cst_15 = arith.constant 0.000000e+00 : f32
    %22 = vector.broadcast %cst_15 : f32 to vector<8x128xf32>
    %23 = arith.maximumf %21, %22 : vector<8x128xf32>
    %24 = arith.truncf %23 : vector<8x128xf32> to vector<8x128xbf16>
    %c0_16 = arith.constant 0 : index
    %c0_17 = arith.constant 0 : index
    %25 = vector.load %arg5[%c0_16, %c0_17] : memref<128x128xbf16, #tpu.memory_space<vmem>>, vector<128x128xbf16>
    %cst_18 = arith.constant dense<0.000000e+00> : vector<8x128xf32>
    %26 = tpu.matmul %24, %25, %cst_18 {dimension_numbers = #tpu.dot_dimension_numbers<[1], [0], [0], [1], [0, 0, 1, 1], [], []>} : vector<8x128xbf16>, vector<128x128xbf16>, vector<8x128xf32> -> vector<8x128xf32>
    %c3 = arith.constant 3 : index
    %c0_19 = arith.constant 0 : index
    %27 = vector.load %arg6[%c3, %c0_19] : memref<4x128xf32, #tpu.memory_space<vmem>>, vector<1x128xf32>
    %28 = vector.broadcast %27 : vector<1x128xf32> to vector<8x128xf32>
    %29 = arith.addf %26, %28 : vector<8x128xf32>
    %c0_20 = arith.constant 0 : index
    %c0_21 = arith.constant 0 : index
    %30 = vector.load %arg7[%c0_20, %c0_21] : memref<8x128xf32, #tpu.memory_space<vmem>>, vector<8x128xf32>
    tpu.vector_store %arg7[%c0_20, %c0_21], %29 {strides = array<i32>} : memref<8x128xf32, #tpu.memory_space<vmem>>, vector<8x128xf32>,
    return
  }
  func.func @transform_0(%arg0: i32) -> (i32, i32) {
    %c0_i32 = arith.constant 0 : i32
    %c0_i32_0 = arith.constant 0 : i32
    return %arg0, %c0_i32 : i32, i32
  }
  func.func @transform_1(%arg0: i32) -> (i32, i32) {
    %c0_i32 = arith.constant 0 : i32
    %c0_i32_0 = arith.constant 0 : i32
    %c0_i32_1 = arith.constant 0 : i32
    return %c0_i32, %c0_i32_0 : i32, i32
  }
  func.func @transform_2(%arg0: i32) -> (i32, i32) {
    %c0_i32 = arith.constant 0 : i32
    %c0_i32_0 = arith.constant 0 : i32
    %c0_i32_1 = arith.constant 0 : i32
    return %c0_i32, %c0_i32_0 : i32, i32
  }
  func.func @transform_3(%arg0: i32) -> (i32, i32) {
    %c0_i32 = arith.constant 0 : i32
    %c0_i32_0 = arith.constant 0 : i32
    %c0_i32_1 = arith.constant 0 : i32
    return %c0_i32, %c0_i32_0 : i32, i32
  }
  func.func @transform_4(%arg0: i32) -> (i32, i32) {
    %c0_i32 = arith.constant 0 : i32
    %c0_i32_0 = arith.constant 0 : i32
    %c0_i32_1 = arith.constant 0 : i32
    return %c0_i32, %c0_i32_0 : i32, i32
  }
  func.func @transform_5(%arg0: i32) -> (i32, i32) {
    %c0_i32 = arith.constant 0 : i32
    %c0_i32_0 = arith.constant 0 : i32
    %c0_i32_1 = arith.constant 0 : i32
    return %c0_i32, %c0_i32_0 : i32, i32
  }
  func.func @transform_6(%arg0: i32) -> (i32, i32) {
    %c0_i32 = arith.constant 0 : i32
    %c0_i32_0 = arith.constant 0 : i32
    return %arg0, %c0_i32 : i32, i32
  }
}

</mosaic_0001>

<bundles_post_ra>
// kernel: tpu_custom_call.1
= control target key start
LH: loop header
LB: loop body
LE: loop exit
PB: predicated region body
PF: predicated region fallthrough
CT: control target
= control target key end

     0   :  { %11 = vsyncpa [#allocation3], 0  ;;  %s768_s0 = inlined_call_operand.hbm [shape: bf16[8,32], index: 0, kind: input, shape index: {}]   ;;  %s769_s1 = inlined_call_operand.hbm [shape: bf16[32,128], index: 1, kind: input, shape index: {}]   ;;  %s770_s2 = inlined_call_operand.hbm [shape: bf16[128,128], index: 2, kind: input, shape index: {}]   ;;  %s771_s3 = inlined_call_operand.hbm [shape: bf16[128,128], index: 3, kind: input, shape index: {}]   ;;  %s772_s4 = inlined_call_operand.hbm [shape: bf16[128,128], index: 4, kind: input, shape index: {}]   ;;  %s773_s5 = inlined_call_operand.vmem [shape: f32[4,128], index: 5, kind: input, shape index: {}]   ;;  %s774_s6 = inlined_call_operand.hbm [shape: f32[8,128], index: 6, kind: output, shape index: {}]  }
   0x1   :  { %12 = vsyncpa [#allocation6], 0 }
   0x2   :  { %13 = vsyncpa [#allocation9], 0  ;;  %s30_s23 = sshll.u32 %s769_s1, 4  ;;  %s31_s23 = int_to_ptr.hbm [resolvable:$true] %s30_s23 }
   0x3   :  { %14 = vsyncpa [#allocation4], 0  ;;  %s695_s24 = smov [#allocation5]   ;;  %s56_s28 = sshll.u32 %s771_s3, 4  ;;  %s57_s28 = int_to_ptr.hbm [resolvable:$true] %s56_s28 }
   0x4   :  { %s32_s25 = sshll.u32 %s695_s24, 4  ;;  %s696_s29 = smov 64   ;;  %s33_s25 = int_to_ptr.vmem [resolvable:$true] %s32_s25 }
   0x5   :  { %s697_s30 = smov 4   ;;  %s698_s7 = smov [#allocation8]  }
   0x6   :  { %38 = dma.hbm_to_vmem [thread:$0]  %s31_s23, 256, %s33_s25, [#allocation6], %s696_s29, %s696_s29, %s697_s30  }
   0x7   :  { %s58_s8 = sshll.u32 %s698_s7, 4  ;;  %s20_s11 = sshll.u32 %s768_s0, 4  ;;  %s59_s8 = int_to_ptr.vmem [resolvable:$true] %s58_s8  ;;  %s21_s11 = int_to_ptr.hbm [resolvable:$true] %s20_s11 }
   0x8   :  { %64 = dma.hbm_to_vmem [thread:$0]  %s57_s28, 1024, %s59_s8, [#allocation9], %s696_s29, %s696_s29, %s697_s30  }
   0x9   :  { %s43_s13 = sshll.u32 %s770_s2, 4  ;;  %s699_s14 = smov [#allocation2]   ;;  %s44_s13 = int_to_ptr.hbm [resolvable:$true] %s43_s13 }
   0xa   :  { %s22_s15 = sshll.u32 %s699_s14, 4  ;;  %s700_s3 = smov [#allocation7]   ;;  %s23_s15 = int_to_ptr.vmem [resolvable:$true] %s22_s15 }
   0xb   :  { %25 = dma.hbm_to_vmem [thread:$0]  %s21_s11, 64, %s23_s15, [#allocation3]  }
   0xc   :  { %s45_s16 = sshll.u32 %s700_s3, 4  ;;  %s69_s19 = sshll.u32 %s772_s4, 4  ;;  %s46_s16 = int_to_ptr.vmem [resolvable:$true] %s45_s16  ;;  %s70_s19 = int_to_ptr.hbm [resolvable:$true] %s69_s19 }
   0xd   :  { %51 = dma.hbm_to_vmem [thread:$0]  %s44_s13, 1024, %s46_s16, [#allocation6], %s696_s29, %s696_s29, %s697_s30  }
   0xe   :  { %s701_s0 = smov [#allocation10]  }
   0xf   :  { %s71_s20 = sshll.u32 %s701_s0, 4  ;;  %s72_s20 = int_to_ptr.vmem [resolvable:$true] %s71_s20 }
  0x10   :  { %77 = dma.hbm_to_vmem [thread:$0]  %s70_s19, 1024, %s72_s20, [#allocation9], %s696_s29, %s696_s29, %s697_s30  }
  0x11   :  { %687 = dma.done.wait [#allocation3], 64  }
  0x12   :  { %688 = vsyncadd [#allocation3], 4294967232 }
  0x13   :  { %689 = dma.done.wait [#allocation6], 1280  }
  0x14   :  { %690 = vsyncadd [#allocation6], 4294966016 }
  0x15   :  { %691 = dma.done.wait [#allocation9], 2048  }
  0x16   :  { %692 = vsyncadd [#allocation9], 4294965248  ;;  %v506_v0 = vld [vmem:[#allocation5 + $0x8] sm:$0xff]  ;;  %v505_v2 = vld [vmem:[#allocation5] sm:$0xff]  ;;  %vm120_vm0 = vcmask 261120   ;;  %s702_s27 = smov [#allocation11]  }
  0x17   :  { %v514_v1 = vld [vmem:[#allocation7 + $0x38] sm:$0xff]  ;;  %130 = vmatpush.bf16.msra.mxu0 %v506_v0  ;;  %v513_v3 = vld [vmem:[#allocation7 + $0x30] sm:$0xff]  ;;  %v101_v4 = vld [vmem:[#allocation2] sm:$0xf]  ;;  %s386_s28 = sshll.u32 %s702_s27, 4  ;;  %s388_s7 = sshll.u32 %s774_s6, 4  ;;  %s387_s28 = int_to_ptr.vmem [resolvable:$true] %s386_s28  ;;  %s389_s7 = int_to_ptr.hbm [resolvable:$true] %s388_s7 }
  0x18   :  { %205 = vmatpush.bf16.msra.mxu1 %v514_v1  ;;  %v512_v5 = vld [vmem:[#allocation7 + $0x28] sm:$0xff]  ;;  %v511_v6 = vld [vmem:[#allocation7 + $0x20] sm:$0xff]  ;;  %v510_v7 = vld [vmem:[#allocation7 + $0x18] sm:$0xff] }
  0x19   :  { %v509_v8 = vld [vmem:[#allocation7 + $0x10] sm:$0xff]  ;;  %v508_v9 = vld [vmem:[#allocation7 + $0x8] sm:$0xff]  ;;  %v507_v10 = vld [vmem:[#allocation7] sm:$0xff] }
  0x1a   :  { %v522_v11 = vld [vmem:[#allocation8 + $0x38] sm:$0xff]  ;;  %v521_v12 = vld [vmem:[#allocation8 + $0x30] sm:$0xff]  ;;  %v520_v13 = vld [vmem:[#allocation8 + $0x28] sm:$0xff] }
  0x1b   :  { %131 = vmatpush.bf16.msra.mxu0 %v505_v2  ;;  %286 = vmatpush.bf16.msra.mxu2 %v522_v11  ;;  %v519_v14 = vld [vmem:[#allocation8 + $0x20] sm:$0xff]  ;;  %v518_v15 = vld [vmem:[#allocation8 + $0x18] sm:$0xff]  ;;  %v517_v16 = vld [vmem:[#allocation8 + $0x10] sm:$0xff] }
  0x1c   :  { %206 = vmatpush.bf16.msra.mxu1 %v513_v3  ;;  %v539_v17 = vld [vmem:[%s773_s5] ss:$0 sm:$0xff]  ;;  %v515_v24 = vld [vmem:[#allocation8] sm:$0xff]  ;;  %v530_v25 = vld [vmem:[#allocation10 + $0x38] sm:$0xff] }
  0x1d   :  { %v516_v23 = vld [vmem:[#allocation8 + $0x8] sm:$0xff]  ;;  %367 = vmatpush.bf16.msra.mxu3 %v530_v25  ;;  %v529_v26 = vld [vmem:[#allocation10 + $0x30] sm:$0xff]  ;;  %v527_v28 = vld [vmem:[#allocation10 + $0x20] sm:$0xff] }
  0x1e   :  { %408 = vmatmul.msk.bf16.vlgmr.msra.gmra.mxu0 %vm120_vm0, %v101_v4  ;;  %v528_v27 = vld [vmem:[#allocation10 + $0x28] sm:$0xff]  ;;  %v526_v29 = vld [vmem:[#allocation10 + $0x18] sm:$0xff]  ;;  %v525_v30 = vld [vmem:[#allocation10 + $0x10] sm:$0xff] }
  0x1f   :  { %287 = vmatpush.bf16.msra.mxu2 %v521_v12  ;;  %v540_v31 = vld [vmem:[%s773_s5 + $0x1] ss:$0 sm:$0xff]  ;;  %v523_v38 = vld [vmem:[#allocation10] sm:$0xff]  ;;  %v541_v39 = vld [vmem:[%s773_s5 + $0x2] ss:$0 sm:$0xff] }
  0x20   :  { %207 = vmatpush.bf16.msra.mxu1 %v512_v5  ;;  %v524_v37 = vld [vmem:[#allocation10 + $0x8] sm:$0xff] }
  0x21   :  { %368 = vmatpush.bf16.msra.mxu3 %v529_v26  ;;  %v542_v45 = vld [vmem:[%s773_s5 + $0x3] ss:$0 sm:$0xff] }
  0x23   :  { %288 = vmatpush.bf16.msra.mxu2 %v520_v13 }
  0x24   :  { %208 = vmatpush.bf16.msra.mxu1 %v511_v6 }
  0x25   :  { %369 = vmatpush.bf16.msra.mxu3 %v528_v27 }
  0x27   :  { %289 = vmatpush.bf16.msra.mxu2 %v519_v14 }
  0x28   :  { %209 = vmatpush.bf16.msra.mxu1 %v510_v7 }
  0x29   :  { %370 = vmatpush.bf16.msra.mxu3 %v527_v28 }
  0x2b   :  { %290 = vmatpush.bf16.msra.mxu2 %v518_v15 }
  0x2c   :  { %210 = vmatpush.bf16.msra.mxu1 %v509_v8 }
  0x2d   :  { %371 = vmatpush.bf16.msra.mxu3 %v526_v29 }
  0x2f   :  { %291 = vmatpush.bf16.msra.mxu2 %v517_v16 }
  0x30   :  { %211 = vmatpush.bf16.msra.mxu1 %v508_v9 }
  0x31   :  { %372 = vmatpush.bf16.msra.mxu3 %v525_v30 }
  0x33   :  { %292 = vmatpush.bf16.msra.mxu2 %v516_v23 }
  0x34   :  { %212 = vmatpush.bf16.msra.mxu1 %v507_v10 }
  0x35   :  { %373 = vmatpush.bf16.msra.mxu3 %v524_v37 }
  0x37   :  { %293 = vmatpush.bf16.msra.mxu2 %v515_v24 }
  0x39   :  { %374 = vmatpush.bf16.msra.mxu3 %v523_v38 }
  0x9b   :  { %v133_v18 = vpop.f32.mrf.mxu0 }
  0x9c   :  { %v134_v19 = vadd.f32 %v539_v17, %v133_v18 }
  0x9e   :  { %v137_v20 = vmax.f32 %v134_v19, 0.0 }
  0xa0   :  { %v138_v21 = vpack.c.bf16 %v137_v20, %v137_v20 }
  0xa2   :  { %213 = vmatmul.bf16.vlgmr.msra.gmra.mxu1 %v138_v21 }
  0xa3   :  { %v135_v22 = vpop.f32.mrf.mxu0 }
 0x11f   :  { %v214_v32 = vpop.f32.mrf.mxu1 }
 0x120   :  { %v215_v33 = vadd.f32 %v540_v31, %v214_v32 }
 0x122   :  { %v218_v34 = vmax.f32 %v215_v33, 0.0 }
 0x124   :  { %v219_v35 = vpack.c.bf16 %v218_v34, %v218_v34 }
 0x126   :  { %294 = vmatmul.bf16.vlgmr.msra.gmra.mxu2 %v219_v35 }
 0x127   :  { %v216_v36 = vpop.f32.mrf.mxu1 }
 0x1a9   :  { %v295_v40 = vpop.f32.mrf.mxu2 }
 0x1aa   :  { %v296_v41 = vadd.f32 %v541_v39, %v295_v40 }
 0x1ac   :  { %v299_v42 = vmax.f32 %v296_v41, 0.0 }
 0x1ae   :  { %v300_v43 = vpack.c.bf16 %v299_v42, %v299_v42 }
 0x1b0   :  { %375 = vmatmul.bf16.vlgmr.msra.gmra.mxu3 %v300_v43 }
 0x1b1   :  { %v297_v44 = vpop.f32.mrf.mxu2 }
 0x233   :  { %v376_v46 = vpop.f32.mrf.mxu3 }
 0x234   :  { %v377_v47 = vadd.f32 %v542_v45, %v376_v46 }
 0x236   :  { %380 = vst [vmem:[#allocation11] sm:$0xff] %v377_v47 }
 0x237   :  { %391 = dma.vmem_to_hbm [thread:$0]  %s387_s28, 128, %s389_s7, [#allocation4]  }
 0x23b   :  { %v378_v48 = vpop.f32.mrf.mxu3 }
 0x23c   :  { %693 = dma.done.wait [#allocation4], 128  }
 0x23d   :  { %694 = vsyncadd [#allocation4], 4294967168 }
 0x23e   :  { %396 = vsyncpa [#allocation3], 1 }
 0x23f   :  { %397 = vsyncpa [#allocation6], 1 }
 0x240   :  { %398 = vsyncpa [#allocation9], 1 }
 0x241   :  { %399 = vsyncpa [#allocation4], 1 }

</bundles_post_ra>
